<compile_context>
chip_gen: v7x
topology: tpu7x:2x2x1
jax: 0.10.0
libtpu: 0.0.40
codegen_flags: <defaults>
</compile_context>

<pallas_src>
import math

import jax
import jax.numpy as jnp
from jax.experimental import pallas as pl
from jax.experimental.pallas import tpu as pltpu

_LOG2E = math.log2(math.e)
# PyTorch semantics: masked = scores*(1-mask) - 10000*mask.  Scores are computed in log2
# space (log2(e)/sqrt(head_size) folded into the Q weights), so the additive mask constant
# is scaled by log2(e) too; exp2 of it still underflows to exactly 0.
_MASK_VALUE = -10000.0 * _LOG2E


def _vmem_capacity_bytes() -> int:
    """Physical VMEM per core; narrow fallback if introspection is unavailable."""
    try:
        return int(pltpu.get_tpu_info().vmem_capacity_bytes)
    except Exception:  # introspection only -- never hides kernel lowering/compile errors
        return 64 * 1024 * 1024  # conservative (v7x-sized) default


def _pick_tile(n: int, target: int) -> int:
    """Largest tile <= target that divides n, keeping the sublane dim a multiple of 8."""
    if n <= target:
        return n
    for t in range(target, 7, -1):
        if t % 8 == 0 and n % t == 0:
            return t
    return n  # fall back to a single (untiled) block along this axis


def _pick_head_group(total_heads: int, hidden: int, head_size: int, budget_bytes: int) -> int:
    """Largest head-group size whose double-buffered bf16 weight block fits the budget."""
    best = 1
    for hg in range(1, total_heads + 1):
        if total_heads % hg == 0 and 2 * (hidden * hg * head_size * 2) <= budget_bytes:
            best = hg
    return best


# ----------------------------- Kernel 1: fused QKV projection -----------------------------
def _qkv_proj_kernel(x_ref, w_ref, b_ref, o_ref):
    """(tm, H) @ (H, hg*hd) on the MXU, then per-head lane-slice stores (head-major output).

    Emitting the (B, 3*num_heads, S, head_size) layout here removes the XLA transpose that
    previously round-tripped Q/K/V through HBM between the two kernels."""
    hg = o_ref.shape[1]
    hd = o_ref.shape[3]
    acc = jnp.dot(x_ref[0], w_ref[0], preferred_element_type=jnp.float32)  # (tm, hg*hd)
    acc = acc + b_ref[0]                                                   # f32 bias add
    for g in range(hg):  # static unroll: lane-slice stores, no in-kernel transpose op
        o_ref[0, g] = acc[:, g * hd:(g + 1) * hd].astype(o_ref.dtype)


# ------------------ Kernel 2: causal flash attention + fused output projection ------------------
def _flash_attn_proj_kernel(q_ref, k_ref, v_ref, wproj_ref, bproj_ref, o_ref,
                            m_sc, l_sc, acc_sc):
    num_heads, tq, head_size = q_ref.shape[1], q_ref.shape[2], q_ref.shape[3]
    tk = k_ref.shape[2]

    qi = pl.program_id(1)
    ki = pl.program_id(2)
    nk = pl.num_programs(2)

    @pl.when(ki == 0)
    def _init():
        m_sc[...] = jnp.full(m_sc.shape, -jnp.inf, jnp.float32)
        l_sc[...] = jnp.zeros(l_sc.shape, jnp.float32)
        acc_sc[...] = jnp.zeros(acc_sc.shape, jnp.float32)

    q_row0 = qi * tq
    k_col0 = ki * tk
    tile_has_work = k_col0 <= q_row0 + (tq - 1)      # some (row, col) with col <= row
    tile_needs_mask = (k_col0 + (tk - 1)) > q_row0   # tile straddles (or is above) the diagonal

    def scores():
        # All heads batched in a single MXU dot_general: (nh,tq,hd) x (nh,tk,hd) -> (nh,tq,tk).
        # Scores are already scaled by log2(e)/sqrt(head_size) (folded into the Q weights).
        return jnp.einsum("hqd,hkd->hqk", q_ref[0], k_ref[0],
                          preferred_element_type=jnp.float32)

    def online_softmax_update(s):
        m_prev = m_sc[...]
        m_new = jnp.maximum(m_prev, jnp.max(s, axis=-1, keepdims=True))
        alpha = jnp.exp2(m_prev - m_new)             # exp2: log2-space softmax, EUP-friendly
        p = jnp.exp2(s - m_new)
        l_sc[...] = alpha * l_sc[...] + jnp.sum(p, axis=-1, keepdims=True)
        acc_sc[...] = alpha * acc_sc[...] + jnp.einsum(
            "hqk,hkd->hqd", p.astype(v_ref.dtype), v_ref[0],
            preferred_element_type=jnp.float32)
        m_sc[...] = m_new

    @pl.when(jnp.logical_and(tile_has_work, tile_needs_mask))
    def _diagonal_tile():  # only tiles straddling the diagonal pay for the select
        s = scores()
        # Single loop-invariant (col - row) iota compared against one scalar offset.
        rel = (jax.lax.broadcasted_iota(jnp.int32, (tq, tk), 1)
               - jax.lax.broadcasted_iota(jnp.int32, (tq, tk), 0))
        online_softmax_update(jnp.where(rel > (q_row0 - k_col0), _MASK_VALUE, s))

    @pl.when(jnp.logical_not(tile_needs_mask))
    def _full_tile():      # entirely at/below the diagonal: no mask work at all
        online_softmax_update(scores())

    # Fully-masked tiles (above the diagonal) skip both branches; their K/V DMA is also
    # suppressed by the clamped index_map in the wrapper.

    @pl.when(ki == nk - 1)
    def _finalize():
        inv_l = pl.reciprocal(l_sc[...], approx=True)          # EUP; deferred normalization
        heads = acc_sc[...] * inv_l                            # (nh, tq, hd) f32
        # Lane-concat heads into (tq, H), then ONE MXU matmul with contraction depth H
        # (instead of num_heads shallow K=head_size matmuls + VPU adds).
        heads2d = jnp.concatenate([heads[h] for h in range(num_heads)], axis=-1)
        out = jnp.dot(heads2d.astype(jnp.bfloat16), wproj_ref[...],
                      preferred_element_type=jnp.float32)
        o_ref[0] = (out + bproj_ref[...]).astype(o_ref.dtype)


# ----------------------------------------- Wrapper -----------------------------------------
def _forward(x, wqkv, bqkv, wproj, bproj, *, num_heads):
    B, S, H = x.shape
    assert H % num_heads == 0
    head_size = H // num_heads
    total_heads = 3 * num_heads

    vmem_cap = _vmem_capacity_bytes()
    # ~85% of physical VMEM: ~108 MiB on v5e/v6e (128 MiB), ~54 MiB on v7x (64 MiB).
    vmem_limit = max(32 * 1024 * 1024, min(int(vmem_cap * 0.85), vmem_cap - 8 * 1024 * 1024))

    # bf16 matmul operands, f32 accumulation everywhere; biases stay f32.
    x_bf = x.astype(jnp.bfloat16)

    # Fold log2(e)/sqrt(head_size) into the Q columns of the fused QKV weight/bias:
    # scales H weight columns once instead of S^2 scores per head.
    col_scale = jnp.concatenate([
        jnp.full((H,), _LOG2E / math.sqrt(head_size), jnp.float32),
        jnp.ones((2 * H,), jnp.float32)])
    wqkv_s = (wqkv.astype(jnp.float32) * col_scale).astype(jnp.bfloat16)   # (H, 3H)
    bqkv_s = bqkv.astype(jnp.float32) * col_scale                          # (1, 3H)
    wproj_bf = wproj.astype(jnp.bfloat16)
    bproj_f = bproj.astype(jnp.float32)

    # ---- Kernel 1: QKV projection -> head-major (B, 3*nh, S, hd) ----
    # Head-group tiling of the weight columns keeps the resident weight block inside the
    # VMEM budget (matters on v7x / very large H); groups may straddle the q/k/v boundary.
    hg = _pick_head_group(total_heads, H, head_size, budget_bytes=vmem_limit // 3)
    n_groups = total_heads // hg
    w_grp = wqkv_s.reshape(H, n_groups, hg * head_size).transpose(1, 0, 2)  # (ng, H, hg*hd)
    b_grp = bqkv_s.reshape(1, n_groups, hg * head_size).transpose(1, 0, 2)  # (ng, 1, hg*hd)

    tm = _pick_tile(S, 512)  # big row tiles amortize the ~0.35 us/grid-step overhead
    qkvh = pl.pallas_call(
        _qkv_proj_kernel,
        out_shape=jax.ShapeDtypeStruct((B, total_heads, S, head_size), jnp.bfloat16),
        grid_spec=pltpu.PrefetchScalarGridSpec(
            num_scalar_prefetch=0,
            grid=(B, n_groups, S // tm),
            in_specs=[
                pl.BlockSpec((1, tm, H), lambda b, g, i: (b, i, 0)),
                pl.BlockSpec((1, H, hg * head_size), lambda b, g, i: (g, 0, 0)),
                pl.BlockSpec((1, 1, hg * head_size), lambda b, g, i: (g, 0, 0)),
            ],
            out_specs=pl.BlockSpec((1, hg, tm, head_size), lambda b, g, i: (b, g, i, 0)),
        ),
        compiler_params=pltpu.CompilerParams(
            dimension_semantics=("parallel", "parallel", "arbitrary"),
            vmem_limit_bytes=vmem_limit),
    )(x_bf, w_grp, b_grp)

    # ---- Kernel 2: causal flash attention + fused output projection ----
    if vmem_cap >= 96 * 1024 * 1024:   # v5e / v6e (128 MiB VMEM): bigger tiles
        tq_target, tk_target = 256, 512
    else:                              # v7x (64 MiB VMEM): smaller q tiles, MXU-deep kv tiles
        tq_target, tk_target = 128, 256
    tq = _pick_tile(S, tq_target)
    tk = _pick_tile(S, tk_target)

    def q_map(b, i, j):
        return (b, 0, i, 0)

    # Clamp the kv block index to the last tile touching the causal diagonal for this q tile:
    # repeated block indices mean the pipeline issues NO new DMA for fully-masked kv steps
    # (~2x less K/V HBM read traffic); the in-kernel pl.when compute-skip stays keyed on
    # the real program_id(2) for correctness.
    def k_map(b, i, j):
        return (b, 1, jnp.minimum(j, (i * tq + tq - 1) // tk), 0)

    def v_map(b, i, j):
        return (b, 2, jnp.minimum(j, (i * tq + tq - 1) // tk), 0)

    out = pl.pallas_call(
        _flash_attn_proj_kernel,
        out_shape=jax.ShapeDtypeStruct((B, S, H), x.dtype),
        grid_spec=pltpu.PrefetchScalarGridSpec(
            num_scalar_prefetch=0,
            grid=(B, S // tq, S // tk),
            in_specs=[
                pl.BlockSpec((1, num_heads, tq, head_size), q_map),
                pl.BlockSpec((1, num_heads, tk, head_size), k_map),
                pl.BlockSpec((1, num_heads, tk, head_size), v_map),
                # TODO(synk): for very large H (>= ~4096 on v7x) wproj should also be tiled
                # along its output dimension to stay inside the 64 MiB VMEM budget.
                pl.BlockSpec((H, H), lambda b, i, j: (0, 0)),
                pl.BlockSpec((1, H), lambda b, i, j: (0, 0)),
            ],
            out_specs=pl.BlockSpec((1, tq, H), lambda b, i, j: (b, i, 0)),
            scratch_shapes=[
                pltpu.VMEM((num_heads, tq, 1), jnp.float32),          # running max (log2 space)
                pltpu.VMEM((num_heads, tq, 1), jnp.float32),          # running denominator
                pltpu.VMEM((num_heads, tq, head_size), jnp.float32),  # unnormalized accumulator
            ],
        ),
        compiler_params=pltpu.CompilerParams(
            # batch + query tiles parallel (megacore sharding); kv axis carries the accumulator.
            dimension_semantics=("parallel", "parallel", "arbitrary"),
            vmem_limit_bytes=vmem_limit),
    )(qkvh, qkvh, qkvh, wproj_bf, bproj_f)
    return out


def unidirectional_attention(x, wqkv, bqkv, wproj, bproj, *, num_heads: int):
    """x: (B, S, H); wqkv: (H, 3H); bqkv: (1, 3H); wproj: (H, H); bproj: (1, H).

    Matches UnidirectionalAttention.forward with blockcache=None."""
    return _forward(x, wqkv, bqkv, wproj, bproj, num_heads=num_heads)


# ---------------------------------------- References ----------------------------------------
def _reference_f32(x, wqkv, bqkv, wproj, bproj, num_heads):
    """Pure f32 reference with the module's exact arithmetic (additive -10000 mask)."""
    B, S, H = x.shape
    n = H // num_heads
    qkv = jnp.einsum("bsh,ho->bso", x, wqkv) + bqkv[0]
    q, k, v = qkv[..., :H], qkv[..., H:2 * H], qkv[..., 2 * H:]

    def split(a):
        return a.reshape(B, S, num_heads, n).transpose(0, 2, 1, 3)

    q, k, v = split(q), split(k), split(v)
    scores = jnp.einsum("bhqn,bhkn->bhqk", q, k) / math.sqrt(n)
    mask = jnp.triu(jnp.ones((S, S), jnp.float32), k=1)
    masked = scores * (1.0 - mask) - 10000.0 * mask
    attn = jax.nn.softmax(masked, axis=-1)
    ws = jnp.einsum("bhqk,bhkn->bhqn", attn, v)
    ws = ws.transpose(0, 2, 1, 3).reshape(B, S, H)
    return jnp.einsum("bsh,ho->bso", ws, wproj) + bproj[0]


def _reference_bf16_matmuls(x, wqkv, bqkv, wproj, bproj, num_heads):
    """Same math mirroring the kernel's precision choices (bf16 operands, f32 accumulation,
    scale folded into the Q weight columns, exp2 softmax)."""
    B, S, H = x.shape
    n = H // num_heads
    bf, f32 = jnp.bfloat16, jnp.float32
    col_scale = jnp.concatenate([jnp.full((H,), _LOG2E / math.sqrt(n), f32),
                                 jnp.ones((2 * H,), f32)])
    wq = (wqkv.astype(f32) * col_scale).astype(bf)
    bq = bqkv.astype(f32) * col_scale
    qkv = jnp.einsum("bsh,ho->bso", x.astype(bf), wq, preferred_element_type=f32) + bq[0]
    qkv = qkv.astype(bf)
    q, k, v = qkv[..., :H], qkv[..., H:2 * H], qkv[..., 2 * H:]

    def split(a):
        return a.reshape(B, S, num_heads, n).transpose(0, 2, 1, 3)

    q, k, v = split(q), split(k), split(v)
    scores = jnp.einsum("bhqn,bhkn->bhqk", q, k, preferred_element_type=f32)  # log2-space
    row = jax.lax.broadcasted_iota(jnp.int32, (S, S), 0)
    col = jax.lax.broadcasted_iota(jnp.int32, (S, S), 1)
    masked = jnp.where(col > row, _MASK_VALUE, scores)
    m = jnp.max(masked, axis=-1, keepdims=True)
    p = jnp.exp2(masked - m)
    attn = p / jnp.sum(p, axis=-1, keepdims=True)
    ws = jnp.einsum("bhqk,bhkn->bhqn", attn.astype(bf), v, preferred_element_type=f32)
    ws = ws.transpose(0, 2, 1, 3).reshape(B, S, H)
    return jnp.einsum("bsh,ho->bso", ws.astype(bf), wproj.astype(bf),
                      preferred_element_type=f32) + bproj[0]


if __name__ == "__main__":
    batch, seq, hidden, num_heads = 2, 8, 32, 4

    key = jax.random.PRNGKey(0)
    kx, kw1, kb1, kw2, kb2 = jax.random.split(key, 5)

    x = jax.random.normal(kx, (batch, seq, hidden), dtype=jnp.float32)

    # Deterministic "nn.Linear"-style init: U(-1/sqrt(in), 1/sqrt(in)); weights stored (in, out).
    bound = 1.0 / math.sqrt(hidden)
    wqkv = jax.random.uniform(kw1, (hidden, 3 * hidden), jnp.float32, -bound, bound)
    bqkv = jax.random.uniform(kb1, (1, 3 * hidden), jnp.float32, -bound, bound)
    wproj = jax.random.uniform(kw2, (hidden, hidden), jnp.float32, -bound, bound)
    bproj = jax.random.uniform(kb2, (1, hidden), jnp.float32, -bound, bound)

    out = unidirectional_attention(x, wqkv, bqkv, wproj, bproj, num_heads=num_heads)
    out = jax.block_until_ready(out)
    assert out.shape == (batch, seq, hidden)

    ref_matched = _reference_bf16_matmuls(x, wqkv, bqkv, wproj, bproj, num_heads)
    ref_f32 = _reference_f32(x, wqkv, bqkv, wproj, bproj, num_heads)
    # Tight check vs. a precision-matched reference; looser sanity check vs. the pure-f32
    # PyTorch-semantics reference (bf16 matmul operands shift results slightly).
    assert jnp.allclose(out, ref_matched, atol=2e-2, rtol=2e-2), "mismatch vs bf16-matched reference"
    assert jnp.allclose(out, ref_f32, atol=1e-1, rtol=1e-1), "mismatch vs f32 reference"

    # TODO(synk): the BlockCache incremental-decode branch (blockcache is not None) is stateful
    # cross-call KV caching; only the full-sequence forward is kernelized here.
    print("KERNEL_OK")
</pallas_src>

<mosaic_0001>
module attributes {stable_mosaic.version = 11 : i64} {
  func.func @_qkv_proj_kernel(%arg0: i32, %arg1: i32, %arg2: i32, %arg3: memref<1x8x32xbf16, #tpu.memory_space<vmem>>, %arg4: memref<1x32x96xbf16, #tpu.memory_space<vmem>>, %arg5: memref<1x1x96xf32, #tpu.memory_space<vmem>>, %arg6: memref<1x12x8x8xbf16, #tpu.memory_space<vmem>>) attributes {dimension_semantics = [#tpu.dimension_semantics<parallel>, #tpu.dimension_semantics<parallel>, #tpu.dimension_semantics<arbitrary>], iteration_bounds = array<i64: 2, 1, 1>, scalar_prefetch = 0 : i64, scratch_operands = 0 : i64, tpu.core_type = #tpu.core_type<tc>, window_params = [{transform_indices = @transform_0, window_bounds = array<i64: 1, 8, 32>}, {transform_indices = @transform_1, window_bounds = array<i64: 1, 32, 96>}, {transform_indices = @transform_2, window_bounds = array<i64: 1, 1, 96>}, {transform_indices = @transform_3, window_bounds = array<i64: 1, 12, 8, 8>}]} {
    %c0 = arith.constant 0 : index
    %c0_0 = arith.constant 0 : index
    %c0_1 = arith.constant 0 : index
    %0 = vector.load %arg3[%c0, %c0_0, %c0_1] : memref<1x8x32xbf16, #tpu.memory_space<vmem>>, vector<1x8x32xbf16>
    %1 = vector.shape_cast %0 : vector<1x8x32xbf16> to vector<8x32xbf16>
    %c0_2 = arith.constant 0 : index
    %c0_3 = arith.constant 0 : index
    %c0_4 = arith.constant 0 : index
    %2 = vector.load %arg4[%c0_2, %c0_3, %c0_4] : memref<1x32x96xbf16, #tpu.memory_space<vmem>>, vector<1x32x96xbf16>
    %3 = vector.shape_cast %2 : vector<1x32x96xbf16> to vector<32x96xbf16>
    %cst = arith.constant dense<0.000000e+00> : vector<8x96xf32>
    %4 = tpu.matmul %1, %3, %cst {dimension_numbers = #tpu.dot_dimension_numbers<[1], [0], [0], [1], [0, 0, 1, 1], [], []>} : vector<8x32xbf16>, vector<32x96xbf16>, vector<8x96xf32> -> vector<8x96xf32>
    %c0_5 = arith.constant 0 : index
    %c0_6 = arith.constant 0 : index
    %c0_7 = arith.constant 0 : index
    %5 = vector.load %arg5[%c0_5, %c0_6, %c0_7] : memref<1x1x96xf32, #tpu.memory_space<vmem>>, vector<1x1x96xf32>
    %6 = vector.shape_cast %5 : vector<1x1x96xf32> to vector<1x96xf32>
    %7 = vector.broadcast %6 : vector<1x96xf32> to vector<8x96xf32>
    %8 = arith.addf %4, %7 : vector<8x96xf32>
    %9 = vector.extract_strided_slice %8 {offsets = [0, 0], sizes = [8, 8], strides = [1, 1]} : vector<8x96xf32> to vector<8x8xf32>
    %10 = arith.truncf %9 : vector<8x8xf32> to vector<8x8xbf16>
    %c0_8 = arith.constant 0 : index
    %c0_9 = arith.constant 0 : index
    %c0_10 = arith.constant 0 : index
    %c0_11 = arith.constant 0 : index
    %11 = vector.load %arg6[%c0_8, %c0_9, %c0_10, %c0_11] : memref<1x12x8x8xbf16, #tpu.memory_space<vmem>>, vector<1x1x8x8xbf16>
    %12 = vector.shape_cast %11 : vector<1x1x8x8xbf16> to vector<8x8xbf16>
    %13 = vector.shape_cast %10 : vector<8x8xbf16> to vector<1x1x8x8xbf16>
    tpu.vector_store %arg6[%c0_8, %c0_9, %c0_10, %c0_11], %13 {strides = array<i32>} : memref<1x12x8x8xbf16, #tpu.memory_space<vmem>>, vector<1x1x8x8xbf16>,
    %14 = vector.extract_strided_slice %8 {offsets = [0, 8], sizes = [8, 8], strides = [1, 1]} : vector<8x96xf32> to vector<8x8xf32>
    %15 = arith.truncf %14 : vector<8x8xf32> to vector<8x8xbf16>
    %c0_12 = arith.constant 0 : index
    %c1 = arith.constant 1 : index
    %c0_13 = arith.constant 0 : index
    %c0_14 = arith.constant 0 : index
    %16 = vector.load %arg6[%c0_12, %c1, %c0_13, %c0_14] : memref<1x12x8x8xbf16, #tpu.memory_space<vmem>>, vector<1x1x8x8xbf16>
    %17 = vector.shape_cast %16 : vector<1x1x8x8xbf16> to vector<8x8xbf16>
    %18 = vector.shape_cast %15 : vector<8x8xbf16> to vector<1x1x8x8xbf16>
    tpu.vector_store %arg6[%c0_12, %c1, %c0_13, %c0_14], %18 {strides = array<i32>} : memref<1x12x8x8xbf16, #tpu.memory_space<vmem>>, vector<1x1x8x8xbf16>,
    %19 = vector.extract_strided_slice %8 {offsets = [0, 16], sizes = [8, 8], strides = [1, 1]} : vector<8x96xf32> to vector<8x8xf32>
    %20 = arith.truncf %19 : vector<8x8xf32> to vector<8x8xbf16>
    %c0_15 = arith.constant 0 : index
    %c2 = arith.constant 2 : index
    %c0_16 = arith.constant 0 : index
    %c0_17 = arith.constant 0 : index
    %21 = vector.load %arg6[%c0_15, %c2, %c0_16, %c0_17] : memref<1x12x8x8xbf16, #tpu.memory_space<vmem>>, vector<1x1x8x8xbf16>
    %22 = vector.shape_cast %21 : vector<1x1x8x8xbf16> to vector<8x8xbf16>
    %23 = vector.shape_cast %20 : vector<8x8xbf16> to vector<1x1x8x8xbf16>
    tpu.vector_store %arg6[%c0_15, %c2, %c0_16, %c0_17], %23 {strides = array<i32>} : memref<1x12x8x8xbf16, #tpu.memory_space<vmem>>, vector<1x1x8x8xbf16>,
    %24 = vector.extract_strided_slice %8 {offsets = [0, 24], sizes = [8, 8], strides = [1, 1]} : vector<8x96xf32> to vector<8x8xf32>
    %25 = arith.truncf %24 : vector<8x8xf32> to vector<8x8xbf16>
    %c0_18 = arith.constant 0 : index
    %c3 = arith.constant 3 : index
    %c0_19 = arith.constant 0 : index
    %c0_20 = arith.constant 0 : index
    %26 = vector.load %arg6[%c0_18, %c3, %c0_19, %c0_20] : memref<1x12x8x8xbf16, #tpu.memory_space<vmem>>, vector<1x1x8x8xbf16>
    %27 = vector.shape_cast %26 : vector<1x1x8x8xbf16> to vector<8x8xbf16>
    %28 = vector.shape_cast %25 : vector<8x8xbf16> to vector<1x1x8x8xbf16>
    tpu.vector_store %arg6[%c0_18, %c3, %c0_19, %c0_20], %28 {strides = array<i32>} : memref<1x12x8x8xbf16, #tpu.memory_space<vmem>>, vector<1x1x8x8xbf16>,
    %29 = vector.extract_strided_slice %8 {offsets = [0, 32], sizes = [8, 8], strides = [1, 1]} : vector<8x96xf32> to vector<8x8xf32>
    %30 = arith.truncf %29 : vector<8x8xf32> to vector<8x8xbf16>
    %c0_21 = arith.constant 0 : index
    %c4 = arith.constant 4 : index
    %c0_22 = arith.constant 0 : index
    %c0_23 = arith.constant 0 : index
    %31 = vector.load %arg6[%c0_21, %c4, %c0_22, %c0_23] : memref<1x12x8x8xbf16, #tpu.memory_space<vmem>>, vector<1x1x8x8xbf16>
    %32 = vector.shape_cast %31 : vector<1x1x8x8xbf16> to vector<8x8xbf16>
    %33 = vector.shape_cast %30 : vector<8x8xbf16> to vector<1x1x8x8xbf16>
    tpu.vector_store %arg6[%c0_21, %c4, %c0_22, %c0_23], %33 {strides = array<i32>} : memref<1x12x8x8xbf16, #tpu.memory_space<vmem>>, vector<1x1x8x8xbf16>,
    %34 = vector.extract_strided_slice %8 {offsets = [0, 40], sizes = [8, 8], strides = [1, 1]} : vector<8x96xf32> to vector<8x8xf32>
    %35 = arith.truncf %34 : vector<8x8xf32> to vector<8x8xbf16>
    %c0_24 = arith.constant 0 : index
    %c5 = arith.constant 5 : index
    %c0_25 = arith.constant 0 : index
    %c0_26 = arith.constant 0 : index
    %36 = vector.load %arg6[%c0_24, %c5, %c0_25, %c0_26] : memref<1x12x8x8xbf16, #tpu.memory_space<vmem>>, vector<1x1x8x8xbf16>
    %37 = vector.shape_cast %36 : vector<1x1x8x8xbf16> to vector<8x8xbf16>
    %38 = vector.shape_cast %35 : vector<8x8xbf16> to vector<1x1x8x8xbf16>
    tpu.vector_store %arg6[%c0_24, %c5, %c0_25, %c0_26], %38 {strides = array<i32>} : memref<1x12x8x8xbf16, #tpu.memory_space<vmem>>, vector<1x1x8x8xbf16>,
    %39 = vector.extract_strided_slice %8 {offsets = [0, 48], sizes = [8, 8], strides = [1, 1]} : vector<8x96xf32> to vector<8x8xf32>
    %40 = arith.truncf %39 : vector<8x8xf32> to vector<8x8xbf16>
    %c0_27 = arith.constant 0 : index
    %c6 = arith.constant 6 : index
    %c0_28 = arith.constant 0 : index
    %c0_29 = arith.constant 0 : index
    %41 = vector.load %arg6[%c0_27, %c6, %c0_28, %c0_29] : memref<1x12x8x8xbf16, #tpu.memory_space<vmem>>, vector<1x1x8x8xbf16>
    %42 = vector.shape_cast %41 : vector<1x1x8x8xbf16> to vector<8x8xbf16>
    %43 = vector.shape_cast %40 : vector<8x8xbf16> to vector<1x1x8x8xbf16>
    tpu.vector_store %arg6[%c0_27, %c6, %c0_28, %c0_29], %43 {strides = array<i32>} : memref<1x12x8x8xbf16, #tpu.memory_space<vmem>>, vector<1x1x8x8xbf16>,
    %44 = vector.extract_strided_slice %8 {offsets = [0, 56], sizes = [8, 8], strides = [1, 1]} : vector<8x96xf32> to vector<8x8xf32>
    %45 = arith.truncf %44 : vector<8x8xf32> to vector<8x8xbf16>
    %c0_30 = arith.constant 0 : index
    %c7 = arith.constant 7 : index
    %c0_31 = arith.constant 0 : index
    %c0_32 = arith.constant 0 : index
    %46 = vector.load %arg6[%c0_30, %c7, %c0_31, %c0_32] : memref<1x12x8x8xbf16, #tpu.memory_space<vmem>>, vector<1x1x8x8xbf16>
    %47 = vector.shape_cast %46 : vector<1x1x8x8xbf16> to vector<8x8xbf16>
    %48 = vector.shape_cast %45 : vector<8x8xbf16> to vector<1x1x8x8xbf16>
    tpu.vector_store %arg6[%c0_30, %c7, %c0_31, %c0_32], %48 {strides = array<i32>} : memref<1x12x8x8xbf16, #tpu.memory_space<vmem>>, vector<1x1x8x8xbf16>,
    %49 = vector.extract_strided_slice %8 {offsets = [0, 64], sizes = [8, 8], strides = [1, 1]} : vector<8x96xf32> to vector<8x8xf32>
    %50 = arith.truncf %49 : vector<8x8xf32> to vector<8x8xbf16>
    %c0_33 = arith.constant 0 : index
    %c8 = arith.constant 8 : index
    %c0_34 = arith.constant 0 : index
    %c0_35 = arith.constant 0 : index
    %51 = vector.load %arg6[%c0_33, %c8, %c0_34, %c0_35] : memref<1x12x8x8xbf16, #tpu.memory_space<vmem>>, vector<1x1x8x8xbf16>
    %52 = vector.shape_cast %51 : vector<1x1x8x8xbf16> to vector<8x8xbf16>
    %53 = vector.shape_cast %50 : vector<8x8xbf16> to vector<1x1x8x8xbf16>
    tpu.vector_store %arg6[%c0_33, %c8, %c0_34, %c0_35], %53 {strides = array<i32>} : memref<1x12x8x8xbf16, #tpu.memory_space<vmem>>, vector<1x1x8x8xbf16>,
    %54 = vector.extract_strided_slice %8 {offsets = [0, 72], sizes = [8, 8], strides = [1, 1]} : vector<8x96xf32> to vector<8x8xf32>
    %55 = arith.truncf %54 : vector<8x8xf32> to vector<8x8xbf16>
    %c0_36 = arith.constant 0 : index
    %c9 = arith.constant 9 : index
    %c0_37 = arith.constant 0 : index
    %c0_38 = arith.constant 0 : index
    %56 = vector.load %arg6[%c0_36, %c9, %c0_37, %c0_38] : memref<1x12x8x8xbf16, #tpu.memory_space<vmem>>, vector<1x1x8x8xbf16>
    %57 = vector.shape_cast %56 : vector<1x1x8x8xbf16> to vector<8x8xbf16>
    %58 = vector.shape_cast %55 : vector<8x8xbf16> to vector<1x1x8x8xbf16>
    tpu.vector_store %arg6[%c0_36, %c9, %c0_37, %c0_38], %58 {strides = array<i32>} : memref<1x12x8x8xbf16, #tpu.memory_space<vmem>>, vector<1x1x8x8xbf16>,
    %59 = vector.extract_strided_slice %8 {offsets = [0, 80], sizes = [8, 8], strides = [1, 1]} : vector<8x96xf32> to vector<8x8xf32>
    %60 = arith.truncf %59 : vector<8x8xf32> to vector<8x8xbf16>
    %c0_39 = arith.constant 0 : index
    %c10 = arith.constant 10 : index
    %c0_40 = arith.constant 0 : index
    %c0_41 = arith.constant 0 : index
    %61 = vector.load %arg6[%c0_39, %c10, %c0_40, %c0_41] : memref<1x12x8x8xbf16, #tpu.memory_space<vmem>>, vector<1x1x8x8xbf16>
    %62 = vector.shape_cast %61 : vector<1x1x8x8xbf16> to vector<8x8xbf16>
    %63 = vector.shape_cast %60 : vector<8x8xbf16> to vector<1x1x8x8xbf16>
    tpu.vector_store %arg6[%c0_39, %c10, %c0_40, %c0_41], %63 {strides = array<i32>} : memref<1x12x8x8xbf16, #tpu.memory_space<vmem>>, vector<1x1x8x8xbf16>,
    %64 = vector.extract_strided_slice %8 {offsets = [0, 88], sizes = [8, 8], strides = [1, 1]} : vector<8x96xf32> to vector<8x8xf32>
    %65 = arith.truncf %64 : vector<8x8xf32> to vector<8x8xbf16>
    %c0_42 = arith.constant 0 : index
    %c11 = arith.constant 11 : index
    %c0_43 = arith.constant 0 : index
    %c0_44 = arith.constant 0 : index
    %66 = vector.load %arg6[%c0_42, %c11, %c0_43, %c0_44] : memref<1x12x8x8xbf16, #tpu.memory_space<vmem>>, vector<1x1x8x8xbf16>
    %67 = vector.shape_cast %66 : vector<1x1x8x8xbf16> to vector<8x8xbf16>
    %68 = vector.shape_cast %65 : vector<8x8xbf16> to vector<1x1x8x8xbf16>
    tpu.vector_store %arg6[%c0_42, %c11, %c0_43, %c0_44], %68 {strides = array<i32>} : memref<1x12x8x8xbf16, #tpu.memory_space<vmem>>, vector<1x1x8x8xbf16>,
    return
  }
  func.func @transform_0(%arg0: i32, %arg1: i32, %arg2: i32) -> (i32, i32, i32) {
    %c0_i32 = arith.constant 0 : i32
    %c0_i32_0 = arith.constant 0 : i32
    return %arg0, %arg2, %c0_i32 : i32, i32, i32
  }
  func.func @transform_1(%arg0: i32, %arg1: i32, %arg2: i32) -> (i32, i32, i32) {
    %c0_i32 = arith.constant 0 : i32
    %c0_i32_0 = arith.constant 0 : i32
    %c0_i32_1 = arith.constant 0 : i32
    return %arg1, %c0_i32, %c0_i32_0 : i32, i32, i32
  }
  func.func @transform_2(%arg0: i32, %arg1: i32, %arg2: i32) -> (i32, i32, i32) {
    %c0_i32 = arith.constant 0 : i32
    %c0_i32_0 = arith.constant 0 : i32
    %c0_i32_1 = arith.constant 0 : i32
    return %arg1, %c0_i32, %c0_i32_0 : i32, i32, i32
  }
  func.func @transform_3(%arg0: i32, %arg1: i32, %arg2: i32) -> (i32, i32, i32, i32) {
    %c0_i32 = arith.constant 0 : i32
    %c0_i32_0 = arith.constant 0 : i32
    return %arg0, %arg1, %arg2, %c0_i32 : i32, i32, i32, i32
  }
}

</mosaic_0001>

<bundles_post_ra>
// kernel: tpu_custom_call.1
= control target key start
LH: loop header
LB: loop body
LE: loop exit
PB: predicated region body
PF: predicated region fallthrough
CT: control target
= control target key end

     0   :  { %8 = vsyncpa [#allocation3], 0  ;;  %s987_s0 = inlined_call_operand.hbm [shape: bf16[2,8,32], index: 0, kind: input, shape index: {}]   ;;  %s988_s1 = inlined_call_operand.hbm [shape: bf16[1,32,96], index: 1, kind: input, shape index: {}]   ;;  %s989_s2 = inlined_call_operand.vmem [shape: f32[1,1,96], index: 2, kind: input, shape index: {}]   ;;  %s990_s3 = inlined_call_operand.vmem [shape: bf16[2,12,8,8], index: 3, kind: output, shape index: {}]  }
   0x1   :  { %10 = vsyncpa [#allocation3 + $0x1], 0 }
   0x2   :  { %11 = vsyncpa [#allocation5], 0  ;;  %s803_s12 = smov 0   ;;  %s805_s13 = smov 0  }
   0x3   :  { %s807_s14 = smov 0   ;;  %s809_s15 = smov 0  }
   0x4   :  { %s811_s16 = smov 0   ;;  %s813_s17 = smov 0  }
   0x5 LB: > { %s526_s18 = sadd.s32 4294967295, %s764_s17   ;;  %p58_p0 = scmp.ne.s32.totalorder %s748_s13, %s744_s12  ;;  %s764_s17 = sphi %s813_s17, %s17_s17   ;;  %s760_s16 = sphi %s811_s16, %s1007_s16   ;;  %s756_s15 = sphi %s809_s15, %s1006_s15   ;;  %s752_s14 = sphi %s807_s14, %s1005_s14   ;;  %s748_s13 = sphi %s805_s13, %s1004_s13   ;;  %s744_s12 = sphi %s803_s12, %s1003_s12  }
   0x6   : > { %p833_p1 = scmp.eq.s32.totalorder %s526_s18, 0  ;;  %p528_p2 = scmp.ge.s32.totalorder %s764_s17, 1 }
   0x7   : > { %p151_p3 = scmp.lt.s32.totalorder %s764_s17, 3  ;;  %s766_s22 = smov [#allocation4]  }
   0x8   : > { %s995_s19 = scalar_select %p833_p1, 1, 0 }
   0x9   : > { %p841_p4 = por %p833_p1, %p58_p0  ;;  %p845_p5 = pnand %p528_p2, %p151_p3 }
   0xa   : > { %s166_s23 = sshll.u32 %s766_s22, 4  ;;  %s36_s25 = sadd.s32 1, %s760_s16  ;;  %s167_s23 = int_to_ptr.vmem [resolvable:$true] %s166_s23 }
   0xb   : > { %s996_s20 = scalar_select %p841_p4, 1, 0 }
   0xc   : > { %s997_s21 = scalar_select %p845_p5, 1, 0 }
   0xd   : > { %p575_p6 = pneg %p845_p5  ;;  %s652_s28 = scalar_lea.hbm %s988_s1, 256 }
   0xe   : > { %p653_p8 = scmp.ne.s32.totalorder %s988_s1, %s652_s28  ;;  %p659_p12 = scmp.lt.u32.totalorder %s652_s28, %s988_s1 }
   0xf   : > { %p853_p7 = pnand %p575_p6, %p833_p1 }
  0x11   : > { %p654_p9 = pneg %p853_p7 }
  0x13   : > { %p655_p10 = pnand %p654_p9, %p653_p8 }
  0x15   : > { %p656_p11 = pneg %p655_p10 }
  0x17   : > { %p661_p13 = pnand %p659_p12, %p656_p11 }
  0x19   : > { %664 = shalt.err (!%p661_p13)
}
  0x1a   : > { %s665_s6 = scalar_lea.vmem %s167_s23, 256  ;;  %p673_p6 = scmp.lt.s32.totalorder %s167_s23, %s167_s23 }
  0x1b   : > { %p666_p0 = scmp.ne.s32.totalorder %s167_s23, %s665_s6  ;;  %p674_p1 = scmp.lt.s32.totalorder %s665_s6, %s665_s6 }
  0x1d   : > { %p668_p2 = pnand %p666_p0, %p654_p9  ;;  %p675_p4 = por %p674_p1, %p673_p6 }
  0x1f   : > { %p669_p3 = pneg %p668_p2 }
  0x21   : > { %p676_p5 = pnand %p675_p4, %p669_p3 }
  0x23   : > { %679 = shalt.err (!%p676_p5)
}
  0x24   : > { %s767_s7 = smov 64   ;;  %s768_s8 = smov 4  }
  0x25   : > { %578 = dma.hbm_to_vmem [thread:$0]  (!%p853_p7), %s988_s1, 256, %s167_s23, [#allocation5], %s767_s7, %s767_s7, %s768_s8  }
  0x26   : > { %p38_p1 = scmp.ge.s32.totalorder %s36_s25, 2  ;;  %s45_s11 = sadd.s32 1, %s752_s14 }
  0x27   : > { %p52_p4 = scmp.ne.s32.totalorder %s752_s14, %s748_s13  ;;  %p53_p5 = scmp.eq.s32.totalorder %s764_s17, 0 }
  0x28   : > { %s1009_s25 = smov (%p38_p1, %s36_s25), 0  ;;  %p584_p9 = scmp.lt.s32.totalorder %s764_s17, 2 }
  0x29   : > { %p54_p8 = por %p53_p5, %p52_p4  ;;  %s40_s12 = ssub.s32 %s760_s16, %s1009_s25 }
  0x2a   : > { %s186_s18 = sand.u32 1, %s752_s14   ;;  %p43_p10 = scmp.eq.s32.totalorder %s40_s12, 0 }
  0x2b   : > { %s532_s22 = sshll.u32 %s186_s18, 2  ;;  %s533_s26 = sshll.u32 %s760_s16, 6 }
  0x2c   : > { %s886_s27 = scalar_select %p43_p10, %s752_s14, %s45_s11  }
  0x2d   : > { %s891_s23 = scalar_lea.hbm %s987_s0, %s533_s26  ;;  %s190_s29 = scalar_lea.vmem [#allocation2], %s532_s22 }
  0x2e   : > { %s198_s30 = sshll.u32 %s190_s29, 4  ;;  %p893_p7 = pnand %p584_p9, %p54_p8  ;;  %s897_s30 = int_to_ptr.vmem [resolvable:$true] %s198_s30 }
  0x2f   : > { %s187_s5 = scalar_lea.sflag [#allocation3], %s186_s18  ;;  %s680_s6 = scalar_lea.hbm %s891_s23, 64 }
  0x30   : > { %p681_p11 = scmp.ne.s32.totalorder %s891_s23, %s680_s6  ;;  %p682_p12 = pneg %p893_p7 }
  0x31   : > { %s685_s9 = scalar_lea.hbm %s987_s0, 128  ;;  %p686_p2 = scmp.lt.u32.totalorder %s891_s23, %s987_s0 }
  0x32   : > { %p683_p13 = pnand %p682_p12, %p681_p11  ;;  %p687_p3 = scmp.lt.u32.totalorder %s685_s9, %s680_s6 }
  0x33   : > { %p689_p1 = scmp.lt.u32.totalorder %s680_s6, %s891_s23 }
  0x34   : > { %p684_p0 = pneg %p683_p13  ;;  %p688_p6 = por %p687_p3, %p686_p2 }
  0x36   : > { %p690_p4 = por %p689_p1, %p688_p6 }
  0x38   : > { %p691_p5 = pnand %p690_p4, %p684_p0 }
  0x3a   : > { %694 = shalt.err (!%p691_p5)
}
  0x3b   : > { %s695_s12 = scalar_lea.vmem %s897_s30, 64  ;;  %s769_s18 = smov [#allocation2]  }
  0x3c   : > { %p696_p8 = scmp.ne.s32.totalorder %s897_s30, %s695_s12  ;;  %s700_s22 = sshll.u32 %s769_s18, 4  ;;  %s701_s22 = int_to_ptr.vmem [resolvable:$false] %s700_s22 }
  0x3d   : > { %s702_s26 = scalar_lea.vmem %s701_s22, 128  ;;  %p703_p11 = scmp.lt.s32.totalorder %s897_s30, %s701_s22 }
  0x3e   : > { %p698_p9 = pnand %p696_p8, %p682_p12  ;;  %p704_p13 = scmp.lt.s32.totalorder %s702_s26, %s695_s12 }
  0x40   : > { %p699_p10 = pneg %p698_p9  ;;  %p705_p2 = por %p704_p13, %p703_p11 }
  0x42   : > { %p706_p3 = pnand %p705_p2, %p699_p10 }
  0x44   : > { %709 = shalt.err (!%p706_p3)
}
  0x45   : > { %582 = dma.hbm_to_vmem [thread:$0]  (!%p893_p7), %s891_s23, 64, %s897_s30, %s187_s5  }
  0x46   : > { %p1000_p0 = scmp.ne.s32.totalorder %s997_s21, 0 }
  0x47   : > { %s209_s24 = sand.u32 (!%p1000_p0), 1, %s748_s13   ;;  %p1001_p12 = scmp.ne.s32.totalorder (!%p1000_p0), %s996_s20, 0 }
  0x48   : > { %207 = sbr.rel (%p1000_p0) target bundleno = 444 (0x1bc), region = 32  ;;  %s535_s28 = sshll.u32 (!%p1000_p0), %s209_s24, 2 }
  0x49   : > { %s210_s29 = scalar_lea.sflag (!%p1000_p0), [#allocation3], %s209_s24  ;;  %s213_s6 = scalar_lea.vmem (!%p1000_p0), [#allocation2], %s535_s28 }
  0x4f   : > { %735 = dma.done.wait (%p1001_p12), %s210_s29, 64  }
  0x50   : > { %737 = vsyncadd (%p1001_p12), %s210_s29, 4294967232  ;;  %p1002_p6 = scmp.ne.s32.totalorder %s995_s19, 0 }
  0x52   : > { %739 = dma.done.wait (%p1002_p6), [#allocation5], 256  }
  0x53   : > { %741 = vsyncadd (%p1002_p6), [#allocation5], 4294967040  ;;  %v770_v0 = vmov 0.0   ;;  %vm771_vm0 = vmmov 0   ;;  %v650_v1 = vld [vmem:[#allocation4] sm:$0xff]   ;;  %v651_v2 = vld [vmem:[#allocation4 + $0x8] sm:$0xff]  }
  0x54   : > { %560 = vmatprep.subr.bf16.mxu0 %v770_v0  ;;  %564 = vmatprep.mubr.msk.bf16.mxu0 %vm771_vm0, %v770_v0  ;;  %v267_v3 = vld [vmem:[%s213_s6] sm:$0xf]  ;;  %vm291_vm1 = vcmask 261120   ;;  %p254_p7 = scmp.lt.s32.totalorder %s756_s15, 1  ;;  %vm336_vm2 = vcmask 60416   ;;  %s772_s5 = smov 104  }
  0x55   : > { %561 = vmatpush3.bf16.msra.mxu0 %v650_v1  ;;  %v538_v4 = vld [vmem:[%s989_s2] ss:$0 sm:$0xff]  ;;  %s773_s7 = smov 120   ;;  %s775_s8 = smov 112  }
  0x56   : > { %562 = vmatprep.subr.bf16.mxu0 %v770_v0  ;;  %s1011_s15 = smov (!%p254_p7, %s756_s15), 1  ;;  %s776_s9 = smov 80  }
  0x57   : > { %s568_s19 = smul.u32 48, %s1011_s15  ;;  %s774_s15 = smov 96  }
  0x58   : > { %s777_s10 = smov 88   ;;  %s778_s11 = smov 64  }
  0x59   : > { %563 = vmatpush3.bf16.msra.mxu0 %v651_v2  ;;  %s943_s4 = scalar_lea.vmem %s990_s3, %s568_s19  ;;  %s779_s12 = smov 72  }
  0x5a   : > { %s780_s18 = smov 48   ;;  %s781_s22 = smov 56  }
  0x5b   : > { %s782_s26 = smov 40  }
  0x5c   : > { %565 = vmatmul.mubr.msk.bf16.vlgmr.msra.gmra.mrb[0].mxu0 %vm291_vm1, %v267_v3 }
 0x12f   : > { %v329_v5 = vpop.f32.mrb[0].mxu0 }
 0x130   : > { %v330_v6 = vadd.f32 %v538_v4, %v329_v5  ;;  %v566_v7 = vpop.f32.mrb[1].mxu0 }
 0x131   : > { %v332_v8 = vpop.f32.mrb[2].mxu0 }
 0x132   : > { %v335_v9 = vpack.c.bf16 %v330_v6, %v330_v6  ;;  %v567_v10 = vpop.f32.mrb[3].mxu0 }
 0x134   : > { %351 = vrot.lane.b32.xlu1 %v335_v9, %s772_s5  ;;  %341 = vrot.lane.b32.xlu0 %v335_v9, %s773_s7  ;;  %337 = vst.msk [vmem:[%s943_s4] sm:$0xf] %vm336_vm2, %v335_v9 }
 0x138   : > { %356 = vrot.lane.b32.xlu1 %v335_v9, %s774_s15  ;;  %346 = vrot.lane.b32.xlu0 %v335_v9, %s775_s8 }
 0x13c   : > { %366 = vrot.lane.b32.xlu1 %v335_v9, %s776_s9  ;;  %361 = vrot.lane.b32.xlu0 %v335_v9, %s777_s10 }
 0x140   : > { %376 = vrot.lane.b32.xlu1 %v335_v9, %s778_s11  ;;  %371 = vrot.lane.b32.xlu0 %v335_v9, %s779_s12 }
 0x144   : > { %386 = vrot.lane.b32.xlu1 %v335_v9, %s780_s18  ;;  %381 = vrot.lane.b32.xlu0 %v335_v9, %s781_s22 }
 0x148   : > { %391 = vrot.lane.b32.xlu0 %v335_v9, %s782_s26 }
 0x1a6   : > { %v352_v11 = vpop.permute.xlu1 %351  ;;  %v342_v12 = vpop.permute.xlu0 %341 }
 0x1a7   : > { %545 = vst.msk [vmem:[%s943_s4 + $0xc] sm:$0xf] %vm336_vm2, %v352_v11  ;;  %543 = vst.msk [vmem:[%s943_s4 + $0x4] sm:$0xf] %vm336_vm2, %v342_v12 }
 0x1aa   : > { %v357_v13 = vpop.permute.xlu1 %356  ;;  %v347_v14 = vpop.permute.xlu0 %346 }
 0x1ab   : > { %546 = vst.msk [vmem:[%s943_s4 + $0x10] sm:$0xf] %vm336_vm2, %v357_v13  ;;  %544 = vst.msk [vmem:[%s943_s4 + $0x8] sm:$0xf] %vm336_vm2, %v347_v14 }
 0x1ae   : > { %v367_v15 = vpop.permute.xlu1 %366  ;;  %v362_v16 = vpop.permute.xlu0 %361 }
 0x1af   : > { %548 = vst.msk [vmem:[%s943_s4 + $0x18] sm:$0xf] %vm336_vm2, %v367_v15  ;;  %547 = vst.msk [vmem:[%s943_s4 + $0x14] sm:$0xf] %vm336_vm2, %v362_v16 }
 0x1b2   : > { %v377_v17 = vpop.permute.xlu1 %376  ;;  %v372_v18 = vpop.permute.xlu0 %371 }
 0x1b3   : > { %550 = vst.msk [vmem:[%s943_s4 + $0x20] sm:$0xf] %vm336_vm2, %v377_v17  ;;  %549 = vst.msk [vmem:[%s943_s4 + $0x1c] sm:$0xf] %vm336_vm2, %v372_v18 }
 0x1b6   : > { %v387_v19 = vpop.permute.xlu1 %386  ;;  %v382_v20 = vpop.permute.xlu0 %381 }
 0x1b7   : > { %552 = vst.msk [vmem:[%s943_s4 + $0x28] sm:$0xf] %vm336_vm2, %v387_v19  ;;  %551 = vst.msk [vmem:[%s943_s4 + $0x24] sm:$0xf] %vm336_vm2, %v382_v20 }
 0x1ba   : > { %v392_v21 = vpop.permute.xlu0 %391 }
 0x1bb   : > { %553 = vst.msk [vmem:[%s943_s4 + $0x2c] sm:$0xf] %vm336_vm2, %v392_v21 }
 0x1bc PF: > { %s17_s17 = sadd.s32 1, %s764_s17   ;;  %s1003_s12 = smov %s748_s13 }
 0x1bd   : > { %p14_p1 = scmp.ge.s32.totalorder %s17_s17, 4   ;;  %s1004_s13 = smov %s752_s14 }
 0x1be   : > { %s1005_s14 = smov %s886_s27  ;;  %s1006_s15 = smov %s760_s16 }
 0x1bf   : > { %s1007_s16 = smov %s1009_s25  ;;  %16 = sbr.rel (!%p14_p1) target bundleno = 5 (0x5), region = 91 }
 0x1c6   :  { %432 = vsyncpa [#allocation3], 1 }
 0x1c7   :  { %434 = vsyncpa [#allocation3 + $0x1], 1 }
 0x1c8   :  { %435 = vsyncpa [#allocation5], 1 }

</bundles_post_ra>
